<compile_context>
chip_gen: v7x
topology: tpu7x:2x2x1
jax: 0.10.0
libtpu: 0.0.40
codegen_flags: <defaults>
</compile_context>

<pallas_src>
import functools

import jax
import jax.numpy as jnp
from jax.experimental import pallas as pl
from jax.experimental.pallas import tpu as pltpu


# ----------------------------------------------------------------------------
# Fused kernel: per-(batch,joint) SSE for all 6 terms of one batch tile.
# ----------------------------------------------------------------------------
def _pose_dis_sse_kernel(idx_ref,
                         sup_ht_ref, cons_ht_ref, con_ht_ref,
                         y_l_ref, y_ul_ref,
                         sup_tgt_ref, unsup_ht_ref, unsup_trans_ref,
                         unsup_hbm_ref,
                         out_ref,
                         perm_buf, perm_sem,
                         *, tb):
    # Heatmap refs: (TB, J, HW) VMEM.  unsup_hbm_ref: full (B, J, HW) in HBM.
    # out_ref: (TB, J, 6) VMEM.  perm_buf: (TB, J, HW) VMEM scratch.
    t = pl.program_id(0)

    # Kick off the mixup-permutation gather for this tile first so the manual
    # DMAs overlap with the five non-permuted terms computed below.  This is
    # self-contained per grid step (no cross-step prefetch), so the batch
    # grid axis can stay "parallel" without any deadlock risk on megacore.
    @pl.loop(0, tb)
    def _(r):
        src = idx_ref[t * tb + r]
        pltpu.make_async_copy(unsup_hbm_ref.at[src], perm_buf.at[r],
                              perm_sem.at[r]).start()

    def row_sse(p, q):
        d = p.astype(jnp.float32) - q.astype(jnp.float32)
        return jnp.sum(d * d, axis=-1, keepdims=True)        # (J, 1)

    # Non-permuted terms, one batch row at a time (bounds live f32 temps to a
    # single (J, HW) slab at a time).
    #   col 0: sup_ht  vs sup_target   (sup_w)   -> loss_pose
    #   col 1: cons_ht vs unsup_trans  (unsup_w) -> loss_cons
    #   col 2: con_ht  vs unsup_ht     (unsup_w) -> loss_mix (lam)
    #   col 3: y_l     vs sup_target   (sup_w)   -> loss_worst (*2)
    #   col 4: y_ul    vs unsup_trans  (unsup_w) -> loss_worst
    #   col 5: con_ht  vs unsup_ht[idx](unsup_w) -> loss_mix (1-lam)
    @pl.loop(0, tb)
    def _(r):
        sup_tgt = sup_tgt_ref[r]
        unsup_trans = unsup_trans_ref[r]
        out_ref[r, :, 0:1] = row_sse(sup_ht_ref[r], sup_tgt)
        out_ref[r, :, 1:2] = row_sse(cons_ht_ref[r], unsup_trans)
        out_ref[r, :, 2:3] = row_sse(con_ht_ref[r], unsup_ht_ref[r])
        out_ref[r, :, 3:4] = row_sse(y_l_ref[r], sup_tgt)
        out_ref[r, :, 4:5] = row_sse(y_ul_ref[r], unsup_trans)

    # Permuted term last: wait for each row's gather, then reduce.
    @pl.loop(0, tb)
    def _(r):
        pltpu.make_async_copy(unsup_hbm_ref.at[0], perm_buf.at[r],
                              perm_sem.at[r]).wait()
        out_ref[r, :, 5:6] = row_sse(con_ht_ref[r], perm_buf[r])


def _choose_batch_tile(B, J, HW, itemsize, vmem_budget_bytes=24 * 1024 * 1024):
    """Largest batch tile whose buffered streams fit the VMEM budget.

    8 auto-pipelined heatmap streams (x2 buffers each) plus one
    single-buffered manual gather buffer; the (TB, J, 6) output block and the
    per-row f32 reduce temporaries are small in comparison.  24 MiB leaves
    headroom under v7x's 32 MiB scoped default (64 MiB physical); v5e/v6e
    have 128 MiB physical.
    """
    bytes_per_row = (8 * 2 + 1) * J * HW * itemsize
    tb = max(1, min(B, vmem_budget_bytes // max(bytes_per_row, 1)))
    if B >= 2:                      # grid length >= 2 keeps both v7x cores busy
        tb = min(tb, max(1, B // 2))
    while B % tb:                   # keep B divisible (no ragged tiles)
        tb -= 1
    return int(tb)


def _fused_pose_sse(indices, sup_ht, cons_ht, con_ht, y_l, y_ul,
                    sup_tgt, unsup_ht, unsup_trans, *, tb=None):
    """All heatmaps pre-flattened to (B, J, HW).  Returns (B, J, 6) f32 SSE."""
    B, J, HW = sup_ht.shape
    if tb is None:
        tb = _choose_batch_tile(B, J, HW, sup_ht.dtype.itemsize)
    grid = B // tb

    hmap = lambda t, idx: (t, 0, 0)
    hspec = pl.BlockSpec((tb, J, HW), hmap)

    kernel = functools.partial(_pose_dis_sse_kernel, tb=tb)

    return pl.pallas_call(
        kernel,
        out_shape=jax.ShapeDtypeStruct((B, J, 6), jnp.float32),
        grid_spec=pltpu.PrefetchScalarGridSpec(
            num_scalar_prefetch=1,
            grid=(grid,),
            in_specs=[hspec] * 8                      # 8 auto-pipelined streams
                     + [pl.BlockSpec(memory_space=pl.ANY)],  # unsup_ht raw HBM
            out_specs=pl.BlockSpec((tb, J, 6), hmap),
            scratch_shapes=[
                pltpu.VMEM((tb, J, HW), unsup_ht.dtype),  # permuted-row buffer
                pltpu.SemaphoreType.DMA((tb,)),
            ]),
        compiler_params=pltpu.CompilerParams(
            dimension_semantics=("parallel",),
            vmem_limit_bytes=48 * 1024 * 1024),
    )(indices, sup_ht, cons_ht, con_ht, y_l, y_ul, sup_tgt, unsup_ht,
      unsup_trans, unsup_ht)


# ----------------------------------------------------------------------------
# PoseDisLoss forward.
# ----------------------------------------------------------------------------
def pose_dis_loss(output, target, target_weight, loss_weights):
    (sup_ht, unsup_ht, unsup_ht_trans, cons_ht, con_ht,
     lam, indices, _unused, y_l, y_ul) = output
    sup_target, unsup_target = target        # unsup_target unused (matches ref)
    sup_w, unsup_w = target_weight
    w_pose, w_cons, w_mix, w_worst = loss_weights

    B, J, H, W = sup_ht.shape
    HW = H * W
    flat = lambda x: x.reshape(B, J, HW)

    # Clamp so a bad permutation index can never become an OOB HBM DMA.
    idx = jnp.clip(indices.astype(jnp.int32), 0, B - 1)

    sse = _fused_pose_sse(
        idx, flat(sup_ht), flat(cons_ht), flat(con_ht), flat(y_l), flat(y_ul),
        flat(sup_target), flat(unsup_ht), flat(unsup_ht_trans))   # (B, J, 6)

    sup_w2 = jnp.square(sup_w.reshape(B, J).astype(jnp.float32))
    unsup_w2 = jnp.square(unsup_w.reshape(B, J).astype(jnp.float32))

    # JointsMSELoss = (1/J) * sum_j 0.5*mean_{B,HW}((w*(p-t))^2)
    #               = 0.5 * sum_{b,j,hw} w[b,j]^2 (p-t)^2 / (B*J*HW)
    norm = 0.5 / jnp.float32(B * J * HW)
    col_w2 = (sup_w2, unsup_w2, unsup_w2, sup_w2, unsup_w2, unsup_w2)
    mse = [norm * jnp.sum(col_w2[k] * sse[:, :, k]) for k in range(6)]

    loss_pose = mse[0]
    loss_cons = mse[1]
    loss_mix = lam * mse[2] + (1.0 - lam) * mse[5]
    loss_worst = 2.0 * mse[3] + mse[4]

    loss = (w_pose * loss_pose + w_cons * loss_cons
            + w_mix * loss_mix + w_worst * loss_worst)
    loss_dic = {'loss_pose': loss_pose, 'loss_cons': loss_cons,
                'loss_fea': loss_mix, 'loss_worst': loss_worst}
    return loss, loss_dic


# ----------------------------------------------------------------------------
# Pure-JAX reference (mirrors the PyTorch per-joint loop) for a sanity check.
# ----------------------------------------------------------------------------
def _joints_mse_ref(pred, tgt, w):
    B, J, H, W = pred.shape
    p = pred.reshape(B, J, -1)
    t = tgt.reshape(B, J, -1)
    w = w.reshape(B, J, 1)
    loss = 0.0
    for j in range(J):
        wj = w[:, j]                      # (B, 1)
        loss = loss + 0.5 * jnp.mean((p[:, j] * wj - t[:, j] * wj) ** 2)
    return loss / J


def _pose_dis_loss_ref(output, target, target_weight, loss_weights):
    (sup_ht, unsup_ht, unsup_ht_trans, cons_ht, con_ht,
     lam, indices, _unused, y_l, y_ul) = output
    sup_target, _ = target
    sup_w, unsup_w = target_weight
    w_pose, w_cons, w_mix, w_worst = loss_weights
    loss_pose = _joints_mse_ref(sup_ht, sup_target, sup_w)
    loss_cons = _joints_mse_ref(cons_ht, unsup_ht_trans, unsup_w)
    loss_mix = (lam * _joints_mse_ref(con_ht, unsup_ht, unsup_w)
                + (1.0 - lam) * _joints_mse_ref(con_ht, unsup_ht[indices], unsup_w))
    loss_worst = (2.0 * _joints_mse_ref(y_l, sup_target, sup_w)
                  + _joints_mse_ref(y_ul, unsup_ht_trans, unsup_w))
    loss = (w_pose * loss_pose + w_cons * loss_cons
            + w_mix * loss_mix + w_worst * loss_worst)
    dic = {'loss_pose': loss_pose, 'loss_cons': loss_cons,
           'loss_fea': loss_mix, 'loss_worst': loss_worst}
    return loss, dic


if __name__ == "__main__":
    key = jax.random.PRNGKey(0)
    B, J, H, W = 8, 24, 16, 16     # B=8 so the batch-tiled path (TB=4, grid=2) runs

    ks = jax.random.split(key, 12)
    sup_ht = jax.random.normal(ks[0], (B, J, H, W), jnp.float32)
    unsup_ht = jax.random.normal(ks[1], (B, J, H, W), jnp.float32)
    unsup_ht_trans = jax.random.normal(ks[2], (B, J, H, W), jnp.float32)
    cons_ht = jax.random.normal(ks[3], (B, J, H, W), jnp.float32)
    con_ht = jax.random.normal(ks[4], (B, J, H, W), jnp.float32)
    y_l = jax.random.normal(ks[5], (B, J, H, W), jnp.float32)
    y_ul = jax.random.normal(ks[6], (B, J, H, W), jnp.float32)
    sup_target = jax.random.normal(ks[7], (B, J, H, W), jnp.float32)
    unsup_target = jax.random.normal(ks[8], (B, J, H, W), jnp.float32)
    sup_w = jax.random.uniform(ks[9], (B, J, 1), jnp.float32, 0.5, 1.0)
    unsup_w = jax.random.uniform(ks[10], (B, J, 1), jnp.float32, 0.5, 1.0)

    lam = jnp.float32(0.7)
    indices = jax.random.permutation(ks[11], B).astype(jnp.int32)  # mixup perm
    placeholder = jnp.zeros((1,), jnp.float32)                     # unused "_" slot

    # deterministic cfg.WEIGHT.{LOSS_POSE, LOSS_CONS, LOSS_MIX, LOSS_WORST}
    loss_weights = (1.0, 1.0, 0.5, 1.0)

    output = (sup_ht, unsup_ht, unsup_ht_trans, cons_ht, con_ht,
              lam, indices, placeholder, y_l, y_ul)
    target = (sup_target, unsup_target)
    target_weight = (sup_w, unsup_w)

    loss, loss_dic = pose_dis_loss(output, target, target_weight, loss_weights)
    loss = jax.block_until_ready(loss)

    ref_loss, ref_dic = _pose_dis_loss_ref(output, target, target_weight,
                                           loss_weights)
    ref_loss = jax.block_until_ready(ref_loss)

    assert jnp.allclose(loss, ref_loss, rtol=1e-4, atol=1e-5), (loss, ref_loss)
    for k in ref_dic:
        assert jnp.allclose(loss_dic[k], ref_dic[k], rtol=1e-4, atol=1e-5), (
            k, loss_dic[k], ref_dic[k])
    print("KERNEL_OK")
</pallas_src>

<mosaic_0001>
module attributes {stable_mosaic.version = 11 : i64} {
  func.func @_pose_dis_sse_kernel(%arg0: i32, %arg1: memref<8xi32, #tpu.memory_space<smem>>, %arg2: memref<4x24x256xf32, #tpu.memory_space<vmem>>, %arg3: memref<4x24x256xf32, #tpu.memory_space<vmem>>, %arg4: memref<4x24x256xf32, #tpu.memory_space<vmem>>, %arg5: memref<4x24x256xf32, #tpu.memory_space<vmem>>, %arg6: memref<4x24x256xf32, #tpu.memory_space<vmem>>, %arg7: memref<4x24x256xf32, #tpu.memory_space<vmem>>, %arg8: memref<4x24x256xf32, #tpu.memory_space<vmem>>, %arg9: memref<4x24x256xf32, #tpu.memory_space<vmem>>, %arg10: memref<8x24x256xf32, #tpu.memory_space<any>>, %arg11: memref<4x24x6xf32, #tpu.memory_space<vmem>>, %arg12: memref<4x24x256xf32, #tpu.memory_space<vmem>>, %arg13: memref<4x!tpu.dma_semaphore, #tpu.memory_space<semaphore_mem>>) attributes {dimension_semantics = [#tpu.dimension_semantics<parallel>], iteration_bounds = array<i64: 2>, scalar_prefetch = 1 : i64, scratch_operands = 2 : i64, tpu.core_type = #tpu.core_type<tc>, window_params = [{transform_indices = @transform_0, window_bounds = array<i64: 4, 24, 256>}, {transform_indices = @transform_1, window_bounds = array<i64: 4, 24, 256>}, {transform_indices = @transform_2, window_bounds = array<i64: 4, 24, 256>}, {transform_indices = @transform_3, window_bounds = array<i64: 4, 24, 256>}, {transform_indices = @transform_4, window_bounds = array<i64: 4, 24, 256>}, {transform_indices = @transform_5, window_bounds = array<i64: 4, 24, 256>}, {transform_indices = @transform_6, window_bounds = array<i64: 4, 24, 256>}, {transform_indices = @transform_7, window_bounds = array<i64: 4, 24, 256>}, {}, {transform_indices = @transform_9, window_bounds = array<i64: 4, 24, 6>}]} {
    %c0_i32 = arith.constant 0 : i32
    %c4_i32 = arith.constant 4 : i32
    %0 = arith.addi %c0_i32, %c4_i32 : i32
    %c1_i32 = arith.constant 1 : i32
    scf.for %arg14 = %c0_i32 to %0 step %c1_i32  : i32 {
      %c1_i32_9 = arith.constant 1 : i32
      %3 = arith.muli %arg14, %c1_i32_9 : i32
      %c0_i32_10 = arith.constant 0 : i32
      %4 = arith.addi %c0_i32_10, %3 : i32
      %c4_i32_11 = arith.constant 4 : i32
      %5 = arith.muli %arg0, %c4_i32_11 : i32
      %6 = arith.addi %5, %4 : i32
      %7 = arith.index_cast %6 : i32 to index
      %8 = memref.load %arg1[%7] : memref<8xi32, #tpu.memory_space<smem>>
      %c0_i32_12 = arith.constant 0 : i32
      %c0_i32_13 = arith.constant 0 : i32
      %9 = tpu.memref_slice %arg10[%8, %c0_i32_12, %c0_i32_13] : memref<8x24x256xf32, #tpu.memory_space<any>> -> memref<1x24x256xf32, #tpu.memory_space<any>>
      %10 = tpu.memref_squeeze %9 : memref<1x24x256xf32, #tpu.memory_space<any>> -> memref<24x256xf32, #tpu.memory_space<any>>
      %c0_i32_14 = arith.constant 0 : i32
      %c0_i32_15 = arith.constant 0 : i32
      %11 = tpu.memref_slice %arg12[%4, %c0_i32_14, %c0_i32_15] : memref<4x24x256xf32, #tpu.memory_space<vmem>> -> memref<1x24x256xf32, #tpu.memory_space<vmem>>
      %12 = tpu.memref_squeeze %11 : memref<1x24x256xf32, #tpu.memory_space<vmem>> -> memref<24x256xf32, #tpu.memory_space<vmem>>
      %13 = tpu.memref_slice %arg13[%4] : memref<4x!tpu.dma_semaphore, #tpu.memory_space<semaphore_mem>> -> memref<1x!tpu.dma_semaphore, #tpu.memory_space<semaphore_mem>>
      %14 = tpu.memref_squeeze %13 : memref<1x!tpu.dma_semaphore, #tpu.memory_space<semaphore_mem>> -> memref<!tpu.dma_semaphore, #tpu.memory_space<semaphore_mem>>
      tpu.enqueue_dma source(%10 : memref<24x256xf32, #tpu.memory_space<any>>) target(%12 : memref<24x256xf32, #tpu.memory_space<vmem>>) target_semaphore(%14 : memref<!tpu.dma_semaphore, #tpu.memory_space<semaphore_mem>>)
    }
    %c4_i32_0 = arith.constant 4 : i32
    %c0_i32_1 = arith.constant 0 : i32
    %c4_i32_2 = arith.constant 4 : i32
    %1 = arith.addi %c0_i32_1, %c4_i32_2 : i32
    %c1_i32_3 = arith.constant 1 : i32
    scf.for %arg14 = %c0_i32_1 to %1 step %c1_i32_3  : i32 {
      %c1_i32_9 = arith.constant 1 : i32
      %3 = arith.muli %arg14, %c1_i32_9 : i32
      %c0_i32_10 = arith.constant 0 : i32
      %4 = arith.addi %c0_i32_10, %3 : i32
      %5 = arith.index_cast %4 : i32 to index
      %c0 = arith.constant 0 : index
      %c0_11 = arith.constant 0 : index
      %6 = vector.load %arg7[%5, %c0, %c0_11] : memref<4x24x256xf32, #tpu.memory_space<vmem>>, vector<1x24x256xf32>
      %7 = vector.shape_cast %6 : vector<1x24x256xf32> to vector<24x256xf32>
      %8 = arith.index_cast %4 : i32 to index
      %c0_12 = arith.constant 0 : index
      %c0_13 = arith.constant 0 : index
      %9 = vector.load %arg9[%8, %c0_12, %c0_13] : memref<4x24x256xf32, #tpu.memory_space<vmem>>, vector<1x24x256xf32>
      %10 = vector.shape_cast %9 : vector<1x24x256xf32> to vector<24x256xf32>
      %11 = arith.index_cast %4 : i32 to index
      %c0_14 = arith.constant 0 : index
      %c0_15 = arith.constant 0 : index
      %12 = vector.load %arg2[%11, %c0_14, %c0_15] : memref<4x24x256xf32, #tpu.memory_space<vmem>>, vector<1x24x256xf32>
      %13 = vector.shape_cast %12 : vector<1x24x256xf32> to vector<24x256xf32>
      %14 = arith.subf %13, %7 : vector<24x256xf32>
      %15 = arith.mulf %14, %14 : vector<24x256xf32>
      %cst = arith.constant dense<0.000000e+00> : vector<24xf32>
      %16 = vector.multi_reduction <add>, %15, %cst [1] : vector<24x256xf32> to vector<24xf32>
      %17 = vector.shape_cast %16 : vector<24xf32> to vector<24x1xf32>
      %18 = arith.index_cast %4 : i32 to index
      %c0_16 = arith.constant 0 : index
      %c0_17 = arith.constant 0 : index
      %19 = vector.load %arg11[%18, %c0_16, %c0_17] : memref<4x24x6xf32, #tpu.memory_space<vmem>>, vector<1x24x1xf32>
      %20 = vector.shape_cast %19 : vector<1x24x1xf32> to vector<24x1xf32>
      %21 = vector.shape_cast %17 : vector<24x1xf32> to vector<1x24x1xf32>
      tpu.vector_store %arg11[%18, %c0_16, %c0_17], %21 {strides = array<i32>} : memref<4x24x6xf32, #tpu.memory_space<vmem>>, vector<1x24x1xf32>,
      %22 = arith.index_cast %4 : i32 to index
      %c0_18 = arith.constant 0 : index
      %c0_19 = arith.constant 0 : index
      %23 = vector.load %arg3[%22, %c0_18, %c0_19] : memref<4x24x256xf32, #tpu.memory_space<vmem>>, vector<1x24x256xf32>
      %24 = vector.shape_cast %23 : vector<1x24x256xf32> to vector<24x256xf32>
      %25 = arith.subf %24, %10 : vector<24x256xf32>
      %26 = arith.mulf %25, %25 : vector<24x256xf32>
      %cst_20 = arith.constant dense<0.000000e+00> : vector<24xf32>
      %27 = vector.multi_reduction <add>, %26, %cst_20 [1] : vector<24x256xf32> to vector<24xf32>
      %28 = vector.shape_cast %27 : vector<24xf32> to vector<24x1xf32>
      %29 = arith.index_cast %4 : i32 to index
      %c0_21 = arith.constant 0 : index
      %c1 = arith.constant 1 : index
      %30 = vector.load %arg11[%29, %c0_21, %c1] : memref<4x24x6xf32, #tpu.memory_space<vmem>>, vector<1x24x1xf32>
      %31 = vector.shape_cast %30 : vector<1x24x1xf32> to vector<24x1xf32>
      %32 = vector.shape_cast %28 : vector<24x1xf32> to vector<1x24x1xf32>
      tpu.vector_store %arg11[%29, %c0_21, %c1], %32 {strides = array<i32>} : memref<4x24x6xf32, #tpu.memory_space<vmem>>, vector<1x24x1xf32>,
      %33 = arith.index_cast %4 : i32 to index
      %c0_22 = arith.constant 0 : index
      %c0_23 = arith.constant 0 : index
      %34 = vector.load %arg4[%33, %c0_22, %c0_23] : memref<4x24x256xf32, #tpu.memory_space<vmem>>, vector<1x24x256xf32>
      %35 = vector.shape_cast %34 : vector<1x24x256xf32> to vector<24x256xf32>
      %36 = arith.index_cast %4 : i32 to index
      %c0_24 = arith.constant 0 : index
      %c0_25 = arith.constant 0 : index
      %37 = vector.load %arg8[%36, %c0_24, %c0_25] : memref<4x24x256xf32, #tpu.memory_space<vmem>>, vector<1x24x256xf32>
      %38 = vector.shape_cast %37 : vector<1x24x256xf32> to vector<24x256xf32>
      %39 = arith.subf %35, %38 : vector<24x256xf32>
      %40 = arith.mulf %39, %39 : vector<24x256xf32>
      %cst_26 = arith.constant dense<0.000000e+00> : vector<24xf32>
      %41 = vector.multi_reduction <add>, %40, %cst_26 [1] : vector<24x256xf32> to vector<24xf32>
      %42 = vector.shape_cast %41 : vector<24xf32> to vector<24x1xf32>
      %43 = arith.index_cast %4 : i32 to index
      %c0_27 = arith.constant 0 : index
      %c2 = arith.constant 2 : index
      %44 = vector.load %arg11[%43, %c0_27, %c2] : memref<4x24x6xf32, #tpu.memory_space<vmem>>, vector<1x24x1xf32>
      %45 = vector.shape_cast %44 : vector<1x24x1xf32> to vector<24x1xf32>
      %46 = vector.shape_cast %42 : vector<24x1xf32> to vector<1x24x1xf32>
      tpu.vector_store %arg11[%43, %c0_27, %c2], %46 {strides = array<i32>} : memref<4x24x6xf32, #tpu.memory_space<vmem>>, vector<1x24x1xf32>,
      %47 = arith.index_cast %4 : i32 to index
      %c0_28 = arith.constant 0 : index
      %c0_29 = arith.constant 0 : index
      %48 = vector.load %arg5[%47, %c0_28, %c0_29] : memref<4x24x256xf32, #tpu.memory_space<vmem>>, vector<1x24x256xf32>
      %49 = vector.shape_cast %48 : vector<1x24x256xf32> to vector<24x256xf32>
      %50 = arith.subf %49, %7 : vector<24x256xf32>
      %51 = arith.mulf %50, %50 : vector<24x256xf32>
      %cst_30 = arith.constant dense<0.000000e+00> : vector<24xf32>
      %52 = vector.multi_reduction <add>, %51, %cst_30 [1] : vector<24x256xf32> to vector<24xf32>
      %53 = vector.shape_cast %52 : vector<24xf32> to vector<24x1xf32>
      %54 = arith.index_cast %4 : i32 to index
      %c0_31 = arith.constant 0 : index
      %c3 = arith.constant 3 : index
      %55 = vector.load %arg11[%54, %c0_31, %c3] : memref<4x24x6xf32, #tpu.memory_space<vmem>>, vector<1x24x1xf32>
      %56 = vector.shape_cast %55 : vector<1x24x1xf32> to vector<24x1xf32>
      %57 = vector.shape_cast %53 : vector<24x1xf32> to vector<1x24x1xf32>
      tpu.vector_store %arg11[%54, %c0_31, %c3], %57 {strides = array<i32>} : memref<4x24x6xf32, #tpu.memory_space<vmem>>, vector<1x24x1xf32>,
      %58 = arith.index_cast %4 : i32 to index
      %c0_32 = arith.constant 0 : index
      %c0_33 = arith.constant 0 : index
      %59 = vector.load %arg6[%58, %c0_32, %c0_33] : memref<4x24x256xf32, #tpu.memory_space<vmem>>, vector<1x24x256xf32>
      %60 = vector.shape_cast %59 : vector<1x24x256xf32> to vector<24x256xf32>
      %61 = arith.subf %60, %10 : vector<24x256xf32>
      %62 = arith.mulf %61, %61 : vector<24x256xf32>
      %cst_34 = arith.constant dense<0.000000e+00> : vector<24xf32>
      %63 = vector.multi_reduction <add>, %62, %cst_34 [1] : vector<24x256xf32> to vector<24xf32>
      %64 = vector.shape_cast %63 : vector<24xf32> to vector<24x1xf32>
      %65 = arith.index_cast %4 : i32 to index
      %c0_35 = arith.constant 0 : index
      %c4 = arith.constant 4 : index
      %66 = vector.load %arg11[%65, %c0_35, %c4] : memref<4x24x6xf32, #tpu.memory_space<vmem>>, vector<1x24x1xf32>
      %67 = vector.shape_cast %66 : vector<1x24x1xf32> to vector<24x1xf32>
      %68 = vector.shape_cast %64 : vector<24x1xf32> to vector<1x24x1xf32>
      tpu.vector_store %arg11[%65, %c0_35, %c4], %68 {strides = array<i32>} : memref<4x24x6xf32, #tpu.memory_space<vmem>>, vector<1x24x1xf32>,
    }
    %c4_i32_4 = arith.constant 4 : i32
    %c0_i32_5 = arith.constant 0 : i32
    %c4_i32_6 = arith.constant 4 : i32
    %2 = arith.addi %c0_i32_5, %c4_i32_6 : i32
    %c1_i32_7 = arith.constant 1 : i32
    scf.for %arg14 = %c0_i32_5 to %2 step %c1_i32_7  : i32 {
      %c1_i32_9 = arith.constant 1 : i32
      %3 = arith.muli %arg14, %c1_i32_9 : i32
      %c0_i32_10 = arith.constant 0 : i32
      %4 = arith.addi %c0_i32_10, %3 : i32
      %c0_i32_11 = arith.constant 0 : i32
      %c0_i32_12 = arith.constant 0 : i32
      %c0_i32_13 = arith.constant 0 : i32
      %5 = tpu.memref_slice %arg10[%c0_i32_11, %c0_i32_12, %c0_i32_13] : memref<8x24x256xf32, #tpu.memory_space<any>> -> memref<1x24x256xf32, #tpu.memory_space<any>>
      %6 = tpu.memref_squeeze %5 : memref<1x24x256xf32, #tpu.memory_space<any>> -> memref<24x256xf32, #tpu.memory_space<any>>
      %c0_i32_14 = arith.constant 0 : i32
      %c0_i32_15 = arith.constant 0 : i32
      %7 = tpu.memref_slice %arg12[%4, %c0_i32_14, %c0_i32_15] : memref<4x24x256xf32, #tpu.memory_space<vmem>> -> memref<1x24x256xf32, #tpu.memory_space<vmem>>
      %8 = tpu.memref_squeeze %7 : memref<1x24x256xf32, #tpu.memory_space<vmem>> -> memref<24x256xf32, #tpu.memory_space<vmem>>
      %9 = tpu.memref_slice %arg13[%4] : memref<4x!tpu.dma_semaphore, #tpu.memory_space<semaphore_mem>> -> memref<1x!tpu.dma_semaphore, #tpu.memory_space<semaphore_mem>>
      %10 = tpu.memref_squeeze %9 : memref<1x!tpu.dma_semaphore, #tpu.memory_space<semaphore_mem>> -> memref<!tpu.dma_semaphore, #tpu.memory_space<semaphore_mem>>
      tpu.wait_dma2 semaphore(%10 : memref<!tpu.dma_semaphore, #tpu.memory_space<semaphore_mem>>) src(%6 : memref<24x256xf32, #tpu.memory_space<any>>) dst(%8 : memref<24x256xf32, #tpu.memory_space<vmem>>)
      %11 = arith.index_cast %4 : i32 to index
      %c0 = arith.constant 0 : index
      %c0_16 = arith.constant 0 : index
      %12 = vector.load %arg4[%11, %c0, %c0_16] : memref<4x24x256xf32, #tpu.memory_space<vmem>>, vector<1x24x256xf32>
      %13 = vector.shape_cast %12 : vector<1x24x256xf32> to vector<24x256xf32>
      %14 = arith.index_cast %4 : i32 to index
      %c0_17 = arith.constant 0 : index
      %c0_18 = arith.constant 0 : index
      %15 = vector.load %arg12[%14, %c0_17, %c0_18] : memref<4x24x256xf32, #tpu.memory_space<vmem>>, vector<1x24x256xf32>
      %16 = vector.shape_cast %15 : vector<1x24x256xf32> to vector<24x256xf32>
      %17 = arith.subf %13, %16 : vector<24x256xf32>
      %18 = arith.mulf %17, %17 : vector<24x256xf32>
      %cst = arith.constant dense<0.000000e+00> : vector<24xf32>
      %19 = vector.multi_reduction <add>, %18, %cst [1] : vector<24x256xf32> to vector<24xf32>
      %20 = vector.shape_cast %19 : vector<24xf32> to vector<24x1xf32>
      %21 = arith.index_cast %4 : i32 to index
      %c0_19 = arith.constant 0 : index
      %c5 = arith.constant 5 : index
      %22 = vector.load %arg11[%21, %c0_19, %c5] : memref<4x24x6xf32, #tpu.memory_space<vmem>>, vector<1x24x1xf32>
      %23 = vector.shape_cast %22 : vector<1x24x1xf32> to vector<24x1xf32>
      %24 = vector.shape_cast %20 : vector<24x1xf32> to vector<1x24x1xf32>
      tpu.vector_store %arg11[%21, %c0_19, %c5], %24 {strides = array<i32>} : memref<4x24x6xf32, #tpu.memory_space<vmem>>, vector<1x24x1xf32>,
    }
    %c4_i32_8 = arith.constant 4 : i32
    return
  }
  func.func @transform_0(%arg0: i32, %arg1: memref<8xi32, #tpu.memory_space<smem>>) -> (i32, i32, i32) {
    %c0_i32 = arith.constant 0 : i32
    %c0_i32_0 = arith.constant 0 : i32
    %c0_i32_1 = arith.constant 0 : i32
    return %arg0, %c0_i32, %c0_i32_0 : i32, i32, i32
  }
  func.func @transform_1(%arg0: i32, %arg1: memref<8xi32, #tpu.memory_space<smem>>) -> (i32, i32, i32) {
    %c0_i32 = arith.constant 0 : i32
    %c0_i32_0 = arith.constant 0 : i32
    %c0_i32_1 = arith.constant 0 : i32
    return %arg0, %c0_i32, %c0_i32_0 : i32, i32, i32
  }
  func.func @transform_2(%arg0: i32, %arg1: memref<8xi32, #tpu.memory_space<smem>>) -> (i32, i32, i32) {
    %c0_i32 = arith.constant 0 : i32
    %c0_i32_0 = arith.constant 0 : i32
    %c0_i32_1 = arith.constant 0 : i32
    return %arg0, %c0_i32, %c0_i32_0 : i32, i32, i32
  }
  func.func @transform_3(%arg0: i32, %arg1: memref<8xi32, #tpu.memory_space<smem>>) -> (i32, i32, i32) {
    %c0_i32 = arith.constant 0 : i32
    %c0_i32_0 = arith.constant 0 : i32
    %c0_i32_1 = arith.constant 0 : i32
    return %arg0, %c0_i32, %c0_i32_0 : i32, i32, i32
  }
  func.func @transform_4(%arg0: i32, %arg1: memref<8xi32, #tpu.memory_space<smem>>) -> (i32, i32, i32) {
    %c0_i32 = arith.constant 0 : i32
    %c0_i32_0 = arith.constant 0 : i32
    %c0_i32_1 = arith.constant 0 : i32
    return %arg0, %c0_i32, %c0_i32_0 : i32, i32, i32
  }
  func.func @transform_5(%arg0: i32, %arg1: memref<8xi32, #tpu.memory_space<smem>>) -> (i32, i32, i32) {
    %c0_i32 = arith.constant 0 : i32
    %c0_i32_0 = arith.constant 0 : i32
    %c0_i32_1 = arith.constant 0 : i32
    return %arg0, %c0_i32, %c0_i32_0 : i32, i32, i32
  }
  func.func @transform_6(%arg0: i32, %arg1: memref<8xi32, #tpu.memory_space<smem>>) -> (i32, i32, i32) {
    %c0_i32 = arith.constant 0 : i32
    %c0_i32_0 = arith.constant 0 : i32
    %c0_i32_1 = arith.constant 0 : i32
    return %arg0, %c0_i32, %c0_i32_0 : i32, i32, i32
  }
  func.func @transform_7(%arg0: i32, %arg1: memref<8xi32, #tpu.memory_space<smem>>) -> (i32, i32, i32) {
    %c0_i32 = arith.constant 0 : i32
    %c0_i32_0 = arith.constant 0 : i32
    %c0_i32_1 = arith.constant 0 : i32
    return %arg0, %c0_i32, %c0_i32_0 : i32, i32, i32
  }
  func.func @transform_9(%arg0: i32, %arg1: memref<8xi32, #tpu.memory_space<smem>>) -> (i32, i32, i32) {
    %c0_i32 = arith.constant 0 : i32
    %c0_i32_0 = arith.constant 0 : i32
    %c0_i32_1 = arith.constant 0 : i32
    return %arg0, %c0_i32, %c0_i32_0 : i32, i32, i32
  }
}

</mosaic_0001>

<bundles_post_ra>
// kernel: tpu_custom_call.1
= control target key start
LH: loop header
LB: loop body
LE: loop exit
PB: predicated region body
PF: predicated region fallthrough
CT: control target
= control target key end

     0   :  { %s2392_s0 = inlined_call_operand.hbm [shape: s32[8], index: 0, kind: input, shape index: {}]   ;;  %s2393_s1 = inlined_call_operand.hbm [shape: f32[8,24,256], index: 1, kind: input, shape index: {}]   ;;  %s2394_s2 = inlined_call_operand.hbm [shape: f32[8,24,256], index: 2, kind: input, shape index: {}]   ;;  %s2395_s3 = inlined_call_operand.hbm [shape: f32[8,24,256], index: 3, kind: input, shape index: {}]   ;;  %s2396_s4 = inlined_call_operand.hbm [shape: f32[8,24,256], index: 4, kind: input, shape index: {}]   ;;  %s2397_s5 = inlined_call_operand.hbm [shape: f32[8,24,256], index: 5, kind: input, shape index: {}]   ;;  %s2398_s6 = inlined_call_operand.hbm [shape: f32[8,24,256], index: 6, kind: input, shape index: {}]   ;;  %s2399_s7 = inlined_call_operand.hbm [shape: f32[8,24,256], index: 7, kind: input, shape index: {}]   ;;  %s2400_s8 = inlined_call_operand.hbm [shape: f32[8,24,256], index: 8, kind: input, shape index: {}]   ;;  %s2401_s9 = inlined_call_operand.hbm [shape: f32[8,24,256], index: 9, kind: input, shape index: {}]   ;;  %s2402_s10 = inlined_call_operand.vmem [shape: f32[8,24,6], index: 10, kind: output, shape index: {}]  }
   0x1   :  { %2414 = sst [smem:[#allocation33_spill]] %s2393_s1  ;;  %s1376_s15 = scalar_lea.hbm %s2392_s0, 16 }
   0x2   :  { %2415 = sst [smem:[#allocation34_spill]] %s2394_s2  ;;  %p1377_p0 = scmp.ne.s32.totalorder %s2392_s0, %s1376_s15 }
   0x3   :  { %2416 = sst [smem:[#allocation35_spill]] %s2396_s4  ;;  %p1380_p1 = scmp.lt.u32.totalorder %s1376_s15, %s2392_s0 }
   0x4   :  { %2417 = sst [smem:[#allocation36_spill]] %s2398_s6 }
   0x5   :  { %2418 = sst [smem:[#allocation37_spill]] %s2401_s9  ;;  %p1382_p2 = pnand %p1380_p1, %p1377_p0 }
   0x7   :  { %1385 = shalt.err (!%p1382_p2)  }
   0x8   :  { %s1730_s20 = smov [#allocation5]  }
   0x9   :  { %16 = dma.hbm_to_smem %s2392_s0, 16, %s1730_s20, [#allocation4] }
   0xa   :  { %1678 = dma.done.wait [#allocation4], 16 }
   0xb   :  { %1679 = vsyncadd [#allocation4], 4294967280 }
   0xc   :  { %18 = sfence }
   0xd   :  { %19 = vsyncpa [#allocation7], 0 }
   0xe   :  { %21 = vsyncpa [#allocation7 + $0x1], 0 }
   0xf   :  { %22 = vsyncpa [#allocation9], 0 }
  0x10   :  { %24 = vsyncpa [#allocation9 + $0x1], 0 }
  0x11   :  { %25 = vsyncpa [#allocation12], 0 }
  0x12   :  { %27 = vsyncpa [#allocation12 + $0x1], 0 }
  0x13   :  { %28 = vsyncpa [#allocation15], 0 }
  0x14   :  { %30 = vsyncpa [#allocation15 + $0x1], 0 }
  0x15   :  { %31 = vsyncpa [#allocation18], 0 }
  0x16   :  { %33 = vsyncpa [#allocation18 + $0x1], 0  ;;  %s1809_s23 = smov 0   ;;  %s1811_s24 = smov 0  }
  0x17   :  { %s1813_s25 = smov 0   ;;  %s1815_s0 = smov 0  }
  0x18 LB: > { %2419 = sst [smem:[#allocation30_spill]] %s1712_s25  ;;  %s1828_s26 = sadd.s32 4294967295, %s1716_s0   ;;  %s1716_s0 = sphi %s1815_s0, %s2446_s0   ;;  %s1712_s25 = sphi %s1813_s25, %s2448_s25   ;;  %s1708_s24 = sphi %s1811_s24, %s2450_s24   ;;  %s1704_s23 = sphi %s1809_s23, %s2449_s23  }
  0x19   : > { %s1831_s27 = sadd.s32 1, %s1716_s0   ;;  %s46_s29 = sadd.s32 1, %s1712_s25 }
  0x1a   : > { %2420 = sst [smem:[#allocation31_spill]] %s1831_s27  ;;  %s43_s28 = ssub.s32 %s1716_s0, %s1831_s27 }
  0x1b   : > { %p44_p3 = scmp.eq.s32.totalorder %s43_s28, 0  ;;  %p53_p4 = scmp.ne.s32.totalorder %s1712_s25, %s1708_s24 }
  0x1c   : > { %p54_p5 = scmp.eq.s32.totalorder %s1716_s0, 0  ;;  %p59_p6 = scmp.ne.s32.totalorder %s1708_s24, %s1704_s23 }
  0x1d   : > { %s1841_s30 = scalar_select %p44_p3, %s1712_s25, %s46_s29  }
  0x1e   : > { %p55_p7 = por %p54_p5, %p53_p4  ;;  %p60_p8 = scmp.eq.s32.totalorder %s1828_s26, 0 }
  0x1f   : > { %2421 = sst [smem:[#allocation32_spill]] %s1841_s30  ;;  %p1316_p9 = scmp.lt.s32.totalorder %s1716_s0, 2 }
  0x20   : > { %p1845_p10 = por %p60_p8, %p59_p6  ;;  %s1850_s12 = sand.u32 1, %s1712_s25  }
  0x21   : > { %s1853_s13 = smul.u32 192, %s1850_s12  ;;  %p1855_p11 = pnand %p1316_p9, %p55_p7 }
  0x22   : > { %s2422_s11 = scalar_select %p1845_p10, 1, 0 }
  0x23   : > { %s1860_s15 = smul.u32 3072, %s1716_s0  ;;  %s1863_s16 = sand.u32 1, %s1716_s0  }
  0x24   : > { %s2424_s2 = sld [smem:[#allocation34_spill]]  ;;  %s317_s20 = scalar_lea.vmem [#allocation8], %s1853_s13 }
  0x25   : > { %s325_s21 = sshll.u32 %s317_s20, 4  ;;  %p1881_p1 = pneg %p1855_p11  ;;  %s1873_s21 = int_to_ptr.vmem [resolvable:$true] %s325_s21 }
  0x2a   : > { %s1869_s19 = scalar_lea.hbm %s2424_s2, %s1860_s15  ;;  %s1391_s18 = scalar_lea.hbm %s2424_s2, 6144 }
  0x2b   : > { %s1386_s23 = scalar_lea.hbm %s1869_s19, 3072  ;;  %p1392_p4 = scmp.lt.u32.totalorder %s1869_s19, %s2424_s2 }
  0x2c   : > { %p1387_p0 = scmp.ne.s32.totalorder %s1869_s19, %s1386_s23  ;;  %p1393_p5 = scmp.lt.u32.totalorder %s1391_s18, %s1386_s23 }
  0x2d   : > { %p1395_p7 = scmp.lt.u32.totalorder %s1386_s23, %s1869_s19 }
  0x2e   : > { %p1389_p2 = pnand %p1881_p1, %p1387_p0  ;;  %p1394_p6 = por %p1393_p5, %p1392_p4 }
  0x30   : > { %p1390_p3 = pneg %p1389_p2  ;;  %p1396_p8 = por %p1395_p7, %p1394_p6 }
  0x32   : > { %p1397_p9 = pnand %p1396_p8, %p1390_p3 }
  0x34   : > { %1400 = shalt.err (!%p1397_p9)
}
  0x35   : > { %s1401_s22 = scalar_lea.vmem %s1873_s21, 3072  ;;  %s1731_s29 = smov [#allocation8]  }
  0x36   : > { %p1402_p0 = scmp.ne.s32.totalorder %s1873_s21, %s1401_s22  ;;  %s1406_s17 = sshll.u32 %s1731_s29, 4  ;;  %s1407_s17 = int_to_ptr.vmem [resolvable:$false] %s1406_s17 }
  0x37   : > { %s1408_s30 = scalar_lea.vmem %s1407_s17, 6144  ;;  %p1409_p13 = scmp.lt.s32.totalorder %s1873_s21, %s1407_s17 }
  0x38   : > { %p1404_p2 = pnand %p1402_p0, %p1881_p1  ;;  %p1410_p10 = scmp.lt.s32.totalorder %s1408_s30, %s1401_s22 }
  0x3a   : > { %p1405_p12 = pneg %p1404_p2  ;;  %p1411_p4 = por %p1410_p10, %p1409_p13 }
  0x3c   : > { %p1412_p5 = pnand %p1411_p4, %p1405_p12 }
  0x3e   : > { %1415 = shalt.err (!%p1412_p5)
}
  0x3f   : > { %s2405_s23 = smov 256   ;;  %s2411_s18 = smov 16  }
  0x40   : > { %s2426_s22 = scalar_lea.sflag [#allocation9], %s1863_s16  ;;  %p2427_p10 = scmp.lt.s32.totalorder %s1716_s0, 3 }
  0x41   : > { %1297 = dma.hbm_to_vmem [thread:$0]  (!%p1855_p11), %s1869_s19, 3072, %s1873_s21, %s2426_s22, %s2405_s23, %s2405_s23, %s2411_s18  }
  0x42   : > { %p2428_p12 = scmp.ge.s32.totalorder %s1716_s0, 1  ;;  %s2430_s4 = sld [smem:[#allocation35_spill]] }
  0x43   : > { %s361_s2 = scalar_lea.vmem [#allocation11], %s1853_s13  ;;  %s2407_s19 = scalar_lea.sflag [#allocation12], %s1863_s16 }
  0x44   : > { %p1913_p13 = pnand %p2428_p12, %p2427_p10  ;;  %s369_s25 = sshll.u32 %s361_s2, 4  ;;  %s1924_s25 = int_to_ptr.vmem [resolvable:$true] %s369_s25 }
  0x46   : > { %s2429_s20 = scalar_select %p1913_p13, 1, 0 }
  0x48   : > { %s1921_s30 = scalar_lea.hbm %s2430_s4, %s1860_s15  ;;  %s1421_s29 = scalar_lea.hbm %s2430_s4, 6144 }
  0x49   : > { %s1416_s21 = scalar_lea.hbm %s1921_s30, 3072  ;;  %p1422_p8 = scmp.lt.u32.totalorder %s1921_s30, %s2430_s4 }
  0x4a   : > { %p1417_p3 = scmp.ne.s32.totalorder %s1921_s30, %s1416_s21  ;;  %p1423_p9 = scmp.lt.u32.totalorder %s1421_s29, %s1416_s21 }
  0x4b   : > { %p1425_p2 = scmp.lt.u32.totalorder %s1416_s21, %s1921_s30 }
  0x4c   : > { %p1419_p6 = pnand %p1417_p3, %p1881_p1  ;;  %p1424_p0 = por %p1423_p9, %p1422_p8 }
  0x4e   : > { %p1420_p7 = pneg %p1419_p6  ;;  %p1426_p4 = por %p1425_p2, %p1424_p0 }
  0x50   : > { %p1427_p5 = pnand %p1426_p4, %p1420_p7 }
  0x52   : > { %1430 = shalt.err (!%p1427_p5)
}
  0x53   : > { %s1431_s2 = scalar_lea.vmem %s1924_s25, 3072  ;;  %s1734_s0 = smov [#allocation11]  }
  0x54   : > { %p1432_p10 = scmp.ne.s32.totalorder %s1924_s25, %s1431_s2  ;;  %s1436_s22 = sshll.u32 %s1734_s0, 4  ;;  %s1437_s22 = int_to_ptr.vmem [resolvable:$false] %s1436_s22 }
  0x55   : > { %s1438_s23 = scalar_lea.vmem %s1437_s22, 6144  ;;  %p1439_p6 = scmp.lt.s32.totalorder %s1924_s25, %s1437_s22 }
  0x56   : > { %p1434_p12 = pnand %p1432_p10, %p1881_p1  ;;  %p1440_p13 = scmp.lt.s32.totalorder %s1438_s23, %s1431_s2 }
  0x58   : > { %p1435_p3 = pneg %p1434_p12  ;;  %p1441_p8 = por %p1440_p13, %p1439_p6 }
  0x5a   : > { %p1442_p9 = pnand %p1441_p8, %p1435_p3 }
  0x5c   : > { %1445 = shalt.err (!%p1442_p9)
}
  0x5d   : > { %s2431_s21 = smov 256   ;;  %s2432_s6 = sld [smem:[#allocation36_spill]] }
  0x5e   : > { %1303 = dma.hbm_to_vmem [thread:$0]  (!%p1855_p11), %s1921_s30, 3072, %s1924_s25, %s2407_s19, %s2431_s21, %s2431_s21, %s2411_s18  }
  0x5f   : > { %s405_s0 = scalar_lea.vmem [#allocation14], %s1853_s13  ;;  %s2410_s23 = scalar_lea.sflag [#allocation15], %s1863_s16 }
  0x60   : > { %s413_s22 = sshll.u32 %s405_s0, 4  ;;  %s1960_s22 = int_to_ptr.vmem [resolvable:$true] %s413_s22 }
  0x63   : > { %s1957_s2 = scalar_lea.hbm %s2432_s6, %s1860_s15  ;;  %s1451_s29 = scalar_lea.hbm %s2432_s6, 6144 }
  0x64   : > { %s1446_s4 = scalar_lea.hbm %s1957_s2, 3072  ;;  %p1452_p2 = scmp.lt.u32.totalorder %s1957_s2, %s2432_s6 }
  0x65   : > { %p1447_p13 = scmp.ne.s32.totalorder %s1957_s2, %s1446_s4  ;;  %p1453_p4 = scmp.lt.u32.totalorder %s1451_s29, %s1446_s4 }
  0x66   : > { %p1455_p10 = scmp.lt.u32.totalorder %s1446_s4, %s1957_s2 }
  0x67   : > { %p1449_p7 = pnand %p1447_p13, %p1881_p1  ;;  %p1454_p5 = por %p1453_p4, %p1452_p2 }
  0x69   : > { %p1450_p0 = pneg %p1449_p7  ;;  %p1456_p12 = por %p1455_p10, %p1454_p5 }
  0x6b   : > { %p1457_p3 = pnand %p1456_p12, %p1450_p0 }
  0x6d   : > { %1460 = shalt.err (!%p1457_p3)
}
  0x6e   : > { %s1461_s0 = scalar_lea.vmem %s1960_s22, 3072  ;;  %s1735_s25 = smov [#allocation14]  }
  0x6f   : > { %p1462_p6 = scmp.ne.s32.totalorder %s1960_s22, %s1461_s0  ;;  %s1466_s30 = sshll.u32 %s1735_s25, 4  ;;  %s1467_s30 = int_to_ptr.vmem [resolvable:$false] %s1466_s30 }
  0x70   : > { %s1468_s19 = scalar_lea.vmem %s1467_s30, 6144  ;;  %p1469_p13 = scmp.lt.s32.totalorder %s1960_s22, %s1467_s30 }
  0x71   : > { %p1464_p8 = pnand %p1462_p6, %p1881_p1  ;;  %p1470_p7 = scmp.lt.s32.totalorder %s1468_s19, %s1461_s0 }
  0x73   : > { %p1465_p9 = pneg %p1464_p8  ;;  %p1471_p2 = por %p1470_p7, %p1469_p13 }
  0x75   : > { %p1472_p4 = pnand %p1471_p2, %p1465_p9 }
  0x77   : > { %1475 = shalt.err (!%p1472_p4)
}
  0x78   : > { %1309 = dma.hbm_to_vmem [thread:$0]  (!%p1855_p11), %s1957_s2, 3072, %s1960_s22, %s2410_s23, %s2431_s21, %s2431_s21, %s2411_s18  }
  0x79   : > { %s2433_s1 = sld [smem:[#allocation33_spill]]  ;;  %s295_s0 = scalar_lea.vmem [#allocation6], %s1853_s13 }
  0x7a   : > { %s303_s25 = sshll.u32 %s295_s0, 4  ;;  %s2002_s6 = scalar_lea.hbm %s2395_s3, %s1860_s15  ;;  %s1996_s25 = int_to_ptr.vmem [resolvable:$true] %s303_s25 }
  0x7b   : > { %s292_s27 = scalar_lea.sflag [#allocation7], %s1850_s12 }
  0x7f   : > { %s1993_s17 = scalar_lea.hbm %s2433_s1, %s1860_s15  ;;  %s1481_s29 = scalar_lea.hbm %s2433_s1, 6144 }
  0x80   : > { %s1476_s2 = scalar_lea.hbm %s1993_s17, 3072  ;;  %p1482_p12 = scmp.lt.u32.totalorder %s1993_s17, %s2433_s1 }
  0x81   : > { %p1477_p0 = scmp.ne.s32.totalorder %s1993_s17, %s1476_s2  ;;  %p1483_p3 = scmp.lt.u32.totalorder %s1481_s29, %s1476_s2 }
  0x82   : > { %p1485_p8 = scmp.lt.u32.totalorder %s1476_s2, %s1993_s17 }
  0x83   : > { %p1479_p5 = pnand %p1477_p0, %p1881_p1  ;;  %p1484_p6 = por %p1483_p3, %p1482_p12 }
  0x85   : > { %p1480_p10 = pneg %p1479_p5  ;;  %p1486_p9 = por %p1485_p8, %p1484_p6 }
  0x87   : > { %p1487_p13 = pnand %p1486_p9, %p1480_p10 }
  0x89   : > { %1490 = shalt.err (!%p1487_p13)
}
  0x8a   : > { %s1491_s0 = scalar_lea.vmem %s1996_s25, 3072  ;;  %s1736_s30 = smov [#allocation6]  }
  0x8b   : > { %p1492_p7 = scmp.ne.s32.totalorder %s1996_s25, %s1491_s0  ;;  %s1496_s19 = sshll.u32 %s1736_s30, 4  ;;  %s1497_s19 = int_to_ptr.vmem [resolvable:$false] %s1496_s19 }
  0x8c   : > { %s1498_s18 = scalar_lea.vmem %s1497_s19, 6144  ;;  %p1499_p0 = scmp.lt.s32.totalorder %s1996_s25, %s1497_s19 }
  0x8d   : > { %p1494_p2 = pnand %p1492_p7, %p1881_p1  ;;  %p1500_p5 = scmp.lt.s32.totalorder %s1498_s18, %s1491_s0 }
  0x8f   : > { %p1495_p4 = pneg %p1494_p2  ;;  %p1501_p12 = por %p1500_p5, %p1499_p0 }
  0x91   : > { %p1502_p3 = pnand %p1501_p12, %p1495_p4 }
  0x93   : > { %1505 = shalt.err (!%p1502_p3)
}
  0x94   : > { %s2434_s23 = smov 16   ;;  %s339_s2 = scalar_lea.vmem [#allocation10], %s1853_s13 }
  0x95   : > { %1294 = dma.hbm_to_vmem [thread:$0]  (!%p1855_p11), %s1993_s17, 3072, %s1996_s25, %s292_s27, %s2431_s21, %s2431_s21, %s2434_s23  }
  0x96   : > { %s347_s22 = sshll.u32 %s339_s2, 4  ;;  %s2038_s0 = scalar_lea.hbm %s2397_s5, %s1860_s15  ;;  %s2032_s22 = int_to_ptr.vmem [resolvable:$true] %s347_s22 }
  0x97   : > { %s1506_s30 = scalar_lea.hbm %s2002_s6, 3072  ;;  %s1511_s1 = scalar_lea.hbm %s2395_s3, 6144 }
  0x98   : > { %p1507_p10 = scmp.ne.s32.totalorder %s2002_s6, %s1506_s30  ;;  %p1512_p9 = scmp.lt.u32.totalorder %s2002_s6, %s2395_s3 }
  0x99   : > { %p1513_p13 = scmp.lt.u32.totalorder %s1511_s1, %s1506_s30  ;;  %p1515_p2 = scmp.lt.u32.totalorder %s1506_s30, %s2002_s6 }
  0x9a   : > { %p1509_p6 = pnand %p1507_p10, %p1881_p1 }
  0x9b   : > { %p1514_p7 = por %p1513_p13, %p1512_p9 }
  0x9c   : > { %p1510_p8 = pneg %p1509_p6 }
  0x9d   : > { %p1516_p4 = por %p1515_p2, %p1514_p7 }
  0x9f   : > { %p1517_p0 = pnand %p1516_p4, %p1510_p8 }
  0xa1   : > { %1520 = shalt.err (!%p1517_p0)
}
  0xa2   : > { %s1521_s17 = scalar_lea.vmem %s2032_s22, 3072  ;;  %s1737_s25 = smov [#allocation10]  }
  0xa3   : > { %p1522_p5 = scmp.ne.s32.totalorder %s2032_s22, %s1521_s17  ;;  %s1526_s2 = sshll.u32 %s1737_s25, 4  ;;  %s1527_s2 = int_to_ptr.vmem [resolvable:$false] %s1526_s2 }
  0xa4   : > { %s1528_s9 = scalar_lea.vmem %s1527_s2, 6144  ;;  %p1529_p10 = scmp.lt.s32.totalorder %s2032_s22, %s1527_s2 }
  0xa5   : > { %p1524_p12 = pnand %p1522_p5, %p1881_p1  ;;  %p1530_p6 = scmp.lt.s32.totalorder %s1528_s9, %s1521_s17 }
  0xa7   : > { %p1525_p3 = pneg %p1524_p12  ;;  %p1531_p9 = por %p1530_p6, %p1529_p10 }
  0xa9   : > { %p1532_p13 = pnand %p1531_p9, %p1525_p3 }
  0xab   : > { %1535 = shalt.err (!%p1532_p13)
}
  0xac   : > { %s2435_s1 = scalar_lea.sflag [#allocation9], %s1863_s16  ;;  %s383_s4 = scalar_lea.vmem [#allocation13], %s1853_s13 }
  0xad   : > { %1300 = dma.hbm_to_vmem [thread:$0]  (!%p1855_p11), %s2002_s6, 3072, %s2032_s22, %s2435_s1, %s2431_s21, %s2431_s21, %s2434_s23  }
  0xae   : > { %s391_s29 = sshll.u32 %s383_s4, 4  ;;  %s2073_s18 = scalar_lea.hbm %s2399_s7, %s1860_s15  ;;  %s2067_s29 = int_to_ptr.vmem [resolvable:$true] %s391_s29 }
  0xaf   : > { %s1536_s27 = scalar_lea.hbm %s2038_s0, 3072  ;;  %s1541_s2 = scalar_lea.hbm %s2397_s5, 6144 }
  0xb0   : > { %p1537_p8 = scmp.ne.s32.totalorder %s2038_s0, %s1536_s27  ;;  %p1542_p4 = scmp.lt.u32.totalorder %s2038_s0, %s2397_s5 }
  0xb1   : > { %p1543_p0 = scmp.lt.u32.totalorder %s1541_s2, %s1536_s27  ;;  %p1545_p12 = scmp.lt.u32.totalorder %s1536_s27, %s2038_s0 }
  0xb2   : > { %p1539_p7 = pnand %p1537_p8, %p1881_p1 }
  0xb3   : > { %p1544_p5 = por %p1543_p0, %p1542_p4 }
  0xb4   : > { %p1540_p2 = pneg %p1539_p7 }
  0xb5   : > { %p1546_p3 = por %p1545_p12, %p1544_p5 }
  0xb7   : > { %p1547_p10 = pnand %p1546_p3, %p1540_p2 }
  0xb9   : > { %1550 = shalt.err (!%p1547_p10)
}
  0xba   : > { %s1551_s22 = scalar_lea.vmem %s2067_s29, 3072  ;;  %s1738_s1 = smov [#allocation13]  }
  0xbb   : > { %p1552_p6 = scmp.ne.s32.totalorder %s2067_s29, %s1551_s22  ;;  %s1556_s4 = sshll.u32 %s1738_s1, 4  ;;  %s1557_s4 = int_to_ptr.vmem [resolvable:$false] %s1556_s4 }
  0xbc   : > { %s1558_s30 = scalar_lea.vmem %s1557_s4, 6144  ;;  %p1559_p8 = scmp.lt.s32.totalorder %s2067_s29, %s1557_s4 }
  0xbd   : > { %p1554_p9 = pnand %p1552_p6, %p1881_p1  ;;  %p1560_p7 = scmp.lt.s32.totalorder %s1558_s30, %s1551_s22 }
  0xbf   : > { %p1555_p13 = pneg %p1554_p9  ;;  %p1561_p4 = por %p1560_p7, %p1559_p8 }
  0xc1   : > { %p1562_p0 = pnand %p1561_p4, %p1555_p13 }
  0xc3   : > { %1565 = shalt.err (!%p1562_p0)
}
  0xc4   : > { %s2436_s19 = scalar_lea.sflag [#allocation12], %s1863_s16  ;;  %s427_s27 = scalar_lea.vmem [#allocation16], %s1853_s13 }
  0xc5   : > { %1306 = dma.hbm_to_vmem [thread:$0]  (!%p1855_p11), %s2038_s0, 3072, %s2067_s29, %s2436_s19, %s2431_s21, %s2431_s21, %s2434_s23  }
  0xc6   : > { %s435_s17 = sshll.u32 %s427_s27, 4  ;;  %s1566_s25 = scalar_lea.hbm %s2073_s18, 3072  ;;  %s2102_s17 = int_to_ptr.vmem [resolvable:$true] %s435_s17 }
  0xc7   : > { %p1567_p2 = scmp.ne.s32.totalorder %s2073_s18, %s1566_s25  ;;  %s1571_s6 = scalar_lea.hbm %s2399_s7, 6144 }
  0xc8   : > { %p1572_p3 = scmp.lt.u32.totalorder %s2073_s18, %s2399_s7  ;;  %p1573_p10 = scmp.lt.u32.totalorder %s1571_s6, %s1566_s25 }
  0xc9   : > { %p1569_p5 = pnand %p1567_p2, %p1881_p1  ;;  %p1575_p9 = scmp.lt.u32.totalorder %s1566_s25, %s2073_s18 }
  0xca   : > { %p1574_p6 = por %p1573_p10, %p1572_p3 }
  0xcb   : > { %p1570_p12 = pneg %p1569_p5 }
  0xcc   : > { %p1576_p13 = por %p1575_p9, %p1574_p6 }
  0xce   : > { %p1577_p8 = pnand %p1576_p13, %p1570_p12 }
  0xd0   : > { %1580 = shalt.err (!%p1577_p8)
}
  0xd1   : > { %s1581_s0 = scalar_lea.vmem %s2102_s17, 3072  ;;  %s1739_s29 = smov [#allocation16]  }
  0xd2   : > { %p1582_p7 = scmp.ne.s32.totalorder %s2102_s17, %s1581_s0  ;;  %s1586_s4 = sshll.u32 %s1739_s29, 4  ;;  %s1587_s4 = int_to_ptr.vmem [resolvable:$false] %s1586_s4 }
  0xd3   : > { %s1588_s30 = scalar_lea.vmem %s1587_s4, 6144  ;;  %p1589_p2 = scmp.lt.s32.totalorder %s2102_s17, %s1587_s4 }
  0xd4   : > { %p1584_p4 = pnand %p1582_p7, %p1881_p1  ;;  %p1590_p5 = scmp.lt.s32.totalorder %s1588_s30, %s1581_s0 }
  0xd6   : > { %p1585_p0 = pneg %p1584_p4  ;;  %p1591_p3 = por %p1590_p5, %p1589_p2 }
  0xd8   : > { %p1592_p10 = pnand %p1591_p3, %p1585_p0 }
  0xda   : > { %1595 = shalt.err (!%p1592_p10)
}
  0xdb   : > { %s2437_s19 = scalar_lea.sflag [#allocation15], %s1863_s16  ;;  %s2134_s2 = scalar_lea.hbm %s2400_s8, %s1860_s15 }
  0xdc   : > { %1312 = dma.hbm_to_vmem [thread:$0]  (!%p1855_p11), %s2073_s18, 3072, %s2102_s17, %s2437_s19, %s2431_s21, %s2431_s21, %s2434_s23  }
  0xdd   : > { %s449_s9 = scalar_lea.vmem [#allocation17], %s1853_s13  ;;  %s446_s16 = scalar_lea.sflag [#allocation18], %s1850_s12 }
  0xde   : > { %s457_s6 = sshll.u32 %s449_s9, 4  ;;  %s1596_s22 = scalar_lea.hbm %s2134_s2, 3072  ;;  %s2137_s6 = int_to_ptr.vmem [resolvable:$true] %s457_s6 }
  0xdf   : > { %p1597_p12 = scmp.ne.s32.totalorder %s2134_s2, %s1596_s22  ;;  %s1601_s1 = scalar_lea.hbm %s2400_s8, 6144 }
  0xe0   : > { %p1602_p13 = scmp.lt.u32.totalorder %s2134_s2, %s2400_s8  ;;  %p1603_p8 = scmp.lt.u32.totalorder %s1601_s1, %s1596_s22 }
  0xe1   : > { %p1599_p6 = pnand %p1597_p12, %p1881_p1  ;;  %p1605_p4 = scmp.lt.u32.totalorder %s1596_s22, %s2134_s2 }
  0xe2   : > { %p1604_p7 = por %p1603_p8, %p1602_p13 }
  0xe3   : > { %p1600_p9 = pneg %p1599_p6 }
  0xe4   : > { %p1606_p0 = por %p1605_p4, %p1604_p7 }
  0xe6   : > { %p1607_p2 = pnand %p1606_p0, %p1600_p9 }
  0xe8   : > { %1610 = shalt.err (!%p1607_p2)
}
  0xe9   : > { %s1611_s13 = scalar_lea.vmem %s2137_s6, 3072  ;;  %s1740_s29 = smov [#allocation17]  }
  0xea   : > { %p1612_p5 = scmp.ne.s32.totalorder %s2137_s6, %s1611_s13  ;;  %s1616_s4 = sshll.u32 %s1740_s29, 4  ;;  %s1617_s4 = int_to_ptr.vmem [resolvable:$false] %s1616_s4 }
  0xeb   : > { %s1618_s30 = scalar_lea.vmem %s1617_s4, 6144  ;;  %p1619_p12 = scmp.lt.s32.totalorder %s2137_s6, %s1617_s4 }
  0xec   : > { %p1614_p3 = pnand %p1612_p5, %p1881_p1  ;;  %p1620_p6 = scmp.lt.s32.totalorder %s1618_s30, %s1611_s13 }
  0xee   : > { %p1615_p10 = pneg %p1614_p3  ;;  %p1621_p13 = por %p1620_p6, %p1619_p12 }
  0xf0   : > { %p1622_p8 = pnand %p1621_p13, %p1615_p10 }
  0xf2   : > { %1625 = shalt.err (!%p1622_p8)
}
  0xf3   : > { %1315 = dma.hbm_to_vmem [thread:$0]  (!%p1855_p11), %s2134_s2, 3072, %s2137_s6, %s446_s16, %s2431_s21, %s2431_s21, %s2434_s23  }
  0xf4   : > { %p2438_p1 = scmp.ne.s32.totalorder %s2429_s20, 0 }
  0xf5   : > { %s471_s28 = sand.u32 (!%p2438_p1), 1, %s1708_s24   ;;  %p2439_p9 = scmp.ne.s32.totalorder (!%p2438_p1), %s2422_s11, 0 }
  0xf6   : > { %469 = sbr.rel (%p2438_p1) target bundleno = 654 (0x28e), region = 52  ;;  %s472_s27 = scalar_lea.sflag (!%p2438_p1), [#allocation7], %s471_s28 }
  0xf7   : > { %s2169_s19 = smul.u32 (!%p2438_p1), 192, %s471_s28 }
  0xf9   : > { %s475_s25 = scalar_lea.vmem (!%p2438_p1), [#allocation6], %s2169_s19 }
  0xfd   : > { %1681 = dma.done.wait (%p2439_p9), %s472_s27, 3072  }
  0xfe   : > { %1683 = vsyncadd (%p2439_p9), %s472_s27, 4294964224  ;;  %s480_s12 = sand.u32 1, %s1828_s26   ;;  %s484_s20 = scalar_lea.vmem [#allocation8], %s2169_s19 }
  0xff   : > { %s481_s14 = scalar_lea.sflag [#allocation9], %s480_s12 }
 0x100   : > { %1685 = dma.done.wait (%p2439_p9), %s481_s14, 6144  }
 0x101   : > { %1687 = vsyncadd (%p2439_p9), %s481_s14, 4294961152  ;;  %s499_s23 = scalar_lea.sflag [#allocation12], %s480_s12 }
 0x102   : > { %1689 = dma.done.wait (%p2439_p9), %s499_s23, 6144  }
 0x103   : > { %1691 = vsyncadd (%p2439_p9), %s499_s23, 4294961152  ;;  %s517_s6 = scalar_lea.sflag [#allocation15], %s480_s12  ;;  %s520_s16 = scalar_lea.vmem [#allocation14], %s2169_s19 }
 0x104   : > { %1693 = dma.done.wait (%p2439_p9), %s517_s6, 6144  }
 0x105   : > { %1695 = vsyncadd (%p2439_p9), %s517_s6, 4294961152  ;;  %s535_s18 = scalar_lea.sflag [#allocation18], %s471_s28  ;;  %s538_s17 = scalar_lea.vmem [#allocation17], %s2169_s19 }
 0x106   : > { %1697 = dma.done.wait (%p2439_p9), %s535_s18, 3072  }
 0x107   : > { %1699 = vsyncadd (%p2439_p9), %s535_s18, 4294964224  ;;  %s2201_s1 = sshll.u32 %s1828_s26, 2  ;;  %s2210_s30 = smov 0  }
 0x108   : > { %p616_p11 = scmp.lt.s32.totalorder %s2201_s1, 7 }
 0x10a   : > { %s617_s15 = scalar_select %p616_p11, %s2201_s1, 7 }
 0x10c   : > { %s1274_s0 = smul.u32 24, %s617_s15 }
 0x10e   : > { %s2208_s4 = scalar_lea.vmem %s2402_s10, %s1274_s0 }
 0x10f LB: >> { %s629_s26 = sadd.s32 %s1720_s30, %s2201_s1  ;;  %s1246_s11 = smul.u32 48, %s1720_s30  ;;  %s1720_s30 = sphi %s2210_s30, %s627_s30  }
 0x110   : >> { %s630_s28 = sld [smem:[#allocation5 + %s629_s26]]  ;;  %s637_s0 = scalar_lea.sflag [#allocation3], %s1720_s30 }
 0x111   : >> { %s636_s27 = scalar_lea.vmem [#allocation2], %s1246_s11  ;;  %s2440_s18 = sld [smem:[#allocation37_spill]] }
 0x112   : >> { %s645_s12 = sshll.u32 %s636_s27, 4  ;;  %s646_s12 = int_to_ptr.vmem [resolvable:$true] %s645_s12 }
 0x116   : >> { %s1245_s14 = smul.u32 768, %s630_s28 }
 0x117   : >> { %s1628_s2 = scalar_lea.hbm %s2440_s18, 6144 }
 0x118   : >> { %s633_s15 = scalar_lea.hbm %s2440_s18, %s1245_s14 }
 0x119   : >> { %s1626_s13 = scalar_lea.hbm %s633_s15, 768  ;;  %p1629_p4 = scmp.lt.u32.totalorder %s633_s15, %s2440_s18 }
 0x11a   : >> { %p1627_p7 = scmp.ne.s32.totalorder %s633_s15, %s1626_s13  ;;  %p1630_p0 = scmp.lt.u32.totalorder %s1628_s2, %s1626_s13 }
 0x11b   : >> { %p1632_p5 = scmp.lt.u32.totalorder %s1626_s13, %s633_s15 }
 0x11c   : >> { %p1631_p2 = por %p1630_p0, %p1629_p4 }
 0x11e   : >> { %p1633_p3 = por %p1632_p5, %p1631_p2 }
 0x120   : >> { %p1634_p10 = pnand %p1633_p3, %p1627_p7 }
 0x122   : >> { %1637 = shalt.err (!%p1634_p10)  }
 0x123   : >> { %s1638_s26 = scalar_lea.vmem %s646_s12, 768  ;;  %s1741_s11 = smov [#allocation2]  }
 0x124   : >> { %p1639_p12 = scmp.ne.s32.totalorder %s646_s12, %s1638_s26  ;;  %s1640_s28 = sshll.u32 %s1741_s11, 4  ;;  %s1641_s28 = int_to_ptr.vmem [resolvable:$false] %s1640_s28 }
 0x125   : >> { %s1642_s27 = scalar_lea.vmem %s1641_s28, 3072  ;;  %p1643_p6 = scmp.lt.s32.totalorder %s646_s12, %s1641_s28 }
 0x126   : >> { %p1644_p13 = scmp.lt.s32.totalorder %s1642_s27, %s1638_s26 }
 0x128   : >> { %p1645_p8 = por %p1644_p13, %p1643_p6 }
 0x12a   : >> { %p1646_p1 = pnand %p1645_p8, %p1639_p12 }
 0x12c   : >> { %1649 = shalt.err (!%p1646_p1)  }
 0x12d   : >> { %648 = dma.hbm_to_vmem [thread:$0]  %s633_s15, 768, %s646_s12, %s637_s0 }
 0x12e   : >> { %s627_s30 = sadd.s32 1, %s1720_s30  }
 0x12f   : >> { %p624_p9 = scmp.ge.s32.totalorder %s627_s30, 4  }
 0x130   : > { %s2231_s21 = smov (%p624_p9), 0  }
 0x131   : > { %626 = sbr.rel (!%p624_p9) target bundleno = 271 (0x10f), region = 221 }
 0x138 LB: >> { %s2237_s2 = smul.u32 48, %s1724_s21  ;;  %s2441_s12 = scalar_lea.vmem [#allocation10], %s2169_s19  ;;  %vm703_vm0 = vcmask 7168   ;;  %vm736_vm1 = vcmask 15368   ;;  %vm777_vm2 = vcmask 23568   ;;  %vm810_vm3 = vcmask 31768   ;;  %s1724_s21 = sphi %s2231_s21, %s654_s21  }
 0x139   : >> { %s2442_s23 = scalar_lea.vmem [#allocation16], %s2169_s19  ;;  %s2443_s15 = scalar_lea.vmem [#allocation11], %s2169_s19  ;;  %vm843_vm4 = vcmask 39968  }
 0x13a   : >> { %s657_s9 = scalar_lea.vmem %s520_s16, %s2237_s2 [#allocation14]  ;;  %s673_s22 = scalar_lea.vmem %s475_s25, %s2237_s2 [#allocation6] }
 0x13b   : >> { %v2245_v0 = vld [vmem:[%s657_s9] sm:$0xff]  ;;  %v2247_v1 = vld [vmem:[%s657_s9 + $0x8] sm:$0xff]  ;;  %s2257_s1 = scalar_lea.vmem %s538_s17, %s2237_s2 [#allocation17]  ;;  %s2262_s30 = scalar_lea.vmem %s484_s20, %s2237_s2 [#allocation8]  ;;  %v2265_v10 = vld [vmem:[%s657_s9 + $0x10] sm:$0xff] }
 0x13c   : >> { %v674_v2 = vld [vmem:[%s673_s22] sm:$0xff]  ;;  %v675_v3 = vld [vmem:[%s673_s22 + $0x8] sm:$0xff]  ;;  %v2269_v14 = vld [vmem:[%s657_s9 + $0x18] sm:$0xff]  ;;  %s2291_s14 = scalar_lea.vmem %s2441_s12, %s2237_s2 [#allocation10]  ;;  %s2296_s6 = scalar_lea.vmem %s2442_s23, %s2237_s2 [#allocation16] }
 0x13d   : >> { %v680_v4 = vsub.f32 %v674_v2, %v2245_v0  ;;  %v2250_v5 = vld [vmem:[%s657_s9 + $0x20] sm:$0xff]  ;;  %v2252_v6 = vld [vmem:[%s657_s9 + $0x28] sm:$0xff]  ;;  %v681_v7 = vsub.f32 %v675_v3, %v2247_v1  ;;  %v676_v15 = vld [vmem:[%s673_s22 + $0x10] sm:$0xff]  ;;  %s782_s0 = scalar_lea.vmem %s2443_s15, %s2237_s2 [#allocation11]  ;;  %s2444_s13 = scalar_lea.vmem [#allocation13], %s2169_s19 }
 0x13e   : >> { %v678_v8 = vld [vmem:[%s673_s22 + $0x20] sm:$0xff]  ;;  %v679_v9 = vld [vmem:[%s673_s22 + $0x28] sm:$0xff]  ;;  %v677_v16 = vld [vmem:[%s673_s22 + $0x18] sm:$0xff]  ;;  %v682_v18 = vsub.f32 %v676_v15, %v2265_v10  ;;  %s815_s29 = scalar_lea.vmem %s2444_s13, %s2237_s2 [#allocation13]  ;;  %s701_s26 = smul.u32 24, %s1724_s21 }
 0x13f   : >> { %v686_v11 = vmul.f32 %v680_v4, %v680_v4  ;;  %v684_v12 = vsub.f32 %v678_v8, %v2250_v5  ;;  %v685_v13 = vsub.f32 %v679_v9, %v2252_v6  ;;  %v687_v17 = vmul.f32 %v681_v7, %v681_v7  ;;  %v2274_v20 = vld [vmem:[%s2257_s1] sm:$0xff]  ;;  %v2277_v21 = vld [vmem:[%s2257_s1 + $0x8] sm:$0xff]  ;;  %v2283_v27 = vld [vmem:[%s2257_s1 + $0x10] sm:$0xff]  ;;  %s654_s21 = sadd.s32 1, %s1724_s21  }
 0x140   : >> { %v683_v19 = vsub.f32 %v677_v16, %v2269_v14  ;;  %v709_v22 = vld [vmem:[%s2262_s30] sm:$0xff]  ;;  %v710_v25 = vld [vmem:[%s2262_s30 + $0x8] sm:$0xff]  ;;  %v2286_v28 = vld [vmem:[%s2257_s1 + $0x18] sm:$0xff]  ;;  %v688_v30 = vmul.f32 %v682_v18, %v682_v18  ;;  %s2345_s11 = scalar_lea.vmem %s2208_s4, %s701_s26  ;;  %p651_p11 = scmp.ge.s32.totalorder %s654_s21, 4  }
 0x141   : >> { %v690_v23 = vmul.f32 %v684_v12, %v684_v12  ;;  %v691_v24 = vmul.f32 %v685_v13, %v685_v13  ;;  %v715_v26 = vsub.f32 %v709_v22, %v2274_v20  ;;  %v692_v29 = vadd.f32 %v687_v17, %v686_v11  ;;  %v711_v33 = vld [vmem:[%s2262_s30 + $0x10] sm:$0xff]  ;;  %v712_v34 = vld [vmem:[%s2262_s30 + $0x18] sm:$0xff]  ;;  %v2302_v35 = vld [vmem:[%s2257_s1 + $0x20] sm:$0xff]  ;;  %s2365_s28 = smov (%p651_p11), 0  }
 0x142   : >> { %v689_v31 = vmul.f32 %v683_v19, %v683_v19  ;;  %v716_v32 = vsub.f32 %v710_v25, %v2277_v21  ;;  %v717_v38 = vsub.f32 %v711_v33, %v2283_v27  ;;  %v718_v39 = vsub.f32 %v712_v34, %v2286_v28  ;;  %v2307_v40 = vld [vmem:[%s2257_s1 + $0x28] sm:$0xff]  ;;  %v713_v41 = vld [vmem:[%s2262_s30 + $0x20] sm:$0xff]  ;;  %v744_v54 = vld [vmem:[%s2291_s14 + $0x10] sm:$0xff] }
 0x143   : >> { %v698_v36 = vadd.f32 %v691_v24, %v690_v23  ;;  %v721_v37 = vmul.f32 %v715_v26, %v715_v26  ;;  %v714_v42 = vld [vmem:[%s2262_s30 + $0x28] sm:$0xff]  ;;  %693 = vadd.xlane.f32.xlu0 %v692_v29  ;;  %v719_v45 = vsub.f32 %v713_v41, %v2302_v35  ;;  %v742_v47 = vld [vmem:[%s2291_s14] sm:$0xff]  ;;  %v745_v55 = vld [vmem:[%s2291_s14 + $0x18] sm:$0xff] }
 0x144   : >> { %v695_v43 = vadd.f32 %v689_v31, %v688_v30  ;;  %v722_v44 = vmul.f32 %v716_v32, %v716_v32  ;;  %v720_v46 = vsub.f32 %v714_v42, %v2307_v40  ;;  %v743_v48 = vld [vmem:[%s2291_s14 + $0x8] sm:$0xff]  ;;  %v750_v49 = vld [vmem:[%s2296_s6] sm:$0xff]  ;;  %v723_v50 = vmul.f32 %v717_v38, %v717_v38  ;;  %v752_v60 = vld [vmem:[%s2296_s6 + $0x10] sm:$0xff] }
 0x145   : >> { %699 = vadd.xlane.f32.xlu1 %v698_v36  ;;  %v724_v51 = vmul.f32 %v718_v39, %v718_v39  ;;  %v751_v52 = vld [vmem:[%s2296_s6 + $0x8] sm:$0xff]  ;;  %v756_v53 = vsub.f32 %v742_v47, %v750_v49  ;;  %v725_v57 = vmul.f32 %v719_v45, %v719_v45  ;;  %v753_v61 = vld [vmem:[%s2296_s6 + $0x18] sm:$0xff]  ;;  %v746_v62 = vld [vmem:[%s2291_s14 + $0x20] sm:$0xff]  ;;  %v758_v3 = vsub.f32 %v744_v54, %v752_v60 }
 0x146   : >> { %v727_v56 = vadd.f32 %v722_v44, %v721_v37  ;;  %v726_v58 = vmul.f32 %v720_v46, %v720_v46  ;;  %v757_v59 = vsub.f32 %v743_v48, %v751_v52  ;;  %v759_v4 = vsub.f32 %v745_v55, %v753_v61  ;;  %v747_v7 = vld [vmem:[%s2291_s14 + $0x28] sm:$0xff]  ;;  %v754_v8 = vld [vmem:[%s2296_s6 + $0x20] sm:$0xff]  ;;  %v785_v18 = vld [vmem:[%s782_s0 + $0x10] sm:$0xff] }
 0x147   : >> { %v730_v63 = vadd.f32 %v724_v51, %v723_v50  ;;  %v762_v2 = vmul.f32 %v756_v53, %v756_v53  ;;  %v755_v9 = vld [vmem:[%s2296_s6 + $0x28] sm:$0xff]  ;;  %696 = vadd.xlane.f32.xlu0 %v695_v43  ;;  %v760_v13 = vsub.f32 %v746_v62, %v754_v8  ;;  %v783_v16 = vld [vmem:[%s782_s0] sm:$0xff]  ;;  %v764_v19 = vmul.f32 %v758_v3, %v758_v3  ;;  %v786_v25 = vld [vmem:[%s782_s0 + $0x18] sm:$0xff] }
 0x148   : >> { %v733_v11 = vadd.f32 %v726_v58, %v725_v57  ;;  %v763_v12 = vmul.f32 %v757_v59, %v757_v59  ;;  %v761_v15 = vsub.f32 %v747_v7, %v755_v9  ;;  %v784_v17 = vld [vmem:[%s782_s0 + $0x8] sm:$0xff]  ;;  %v765_v22 = vmul.f32 %v759_v4, %v759_v4  ;;  %v787_v26 = vld [vmem:[%s782_s0 + $0x20] sm:$0xff]  ;;  %v818_v42 = vld [vmem:[%s815_s29 + $0x10] sm:$0xff] }
 0x149   : >> { %728 = vadd.xlane.f32.xlu1 %v727_v56  ;;  %v789_v23 = vsub.f32 %v783_v16, %v2245_v0  ;;  %v790_v24 = vsub.f32 %v784_v17, %v2247_v1  ;;  %v788_v29 = vld [vmem:[%s782_s0 + $0x28] sm:$0xff]  ;;  %v791_v31 = vsub.f32 %v785_v18, %v2265_v10  ;;  %v792_v32 = vsub.f32 %v786_v25, %v2269_v14  ;;  %v816_v39 = vld [vmem:[%s815_s29] sm:$0xff]  ;;  %v819_v43 = vld [vmem:[%s815_s29 + $0x18] sm:$0xff] }
 0x14a   : >> { %v768_v30 = vadd.f32 %v763_v12, %v762_v2  ;;  %v766_v33 = vmul.f32 %v760_v13, %v760_v13  ;;  %v767_v34 = vmul.f32 %v761_v15, %v761_v15  ;;  %v771_v38 = vadd.f32 %v765_v22, %v764_v19  ;;  %v817_v41 = vld [vmem:[%s815_s29 + $0x8] sm:$0xff]  ;;  %v820_v50 = vld [vmem:[%s815_s29 + $0x20] sm:$0xff] }
 0x14b   : >> { %731 = vadd.xlane.f32.xlu0 %v730_v63  ;;  %v795_v36 = vmul.f32 %v789_v23, %v789_v23  ;;  %v796_v37 = vmul.f32 %v790_v24, %v790_v24  ;;  %v793_v0 = vsub.f32 %v787_v26, %v2250_v5  ;;  %v794_v1 = vsub.f32 %v788_v29, %v2252_v6  ;;  %v821_v51 = vld [vmem:[%s815_s29 + $0x28] sm:$0xff] }
 0x14c   : >> { %v797_v44 = vmul.f32 %v791_v31, %v791_v31  ;;  %v798_v45 = vmul.f32 %v792_v32, %v792_v32  ;;  %v774_v10 = vadd.f32 %v767_v34, %v766_v33  ;;  %v822_v46 = vsub.f32 %v816_v39, %v2274_v20 }
 0x14d   : >> { %734 = vadd.xlane.f32.xlu1 %v733_v11  ;;  %v801_v14 = vadd.f32 %v796_v37, %v795_v36  ;;  %v823_v47 = vsub.f32 %v817_v41, %v2277_v21  ;;  %v799_v48 = vmul.f32 %v793_v0, %v793_v0  ;;  %v800_v49 = vmul.f32 %v794_v1, %v794_v1 }
 0x14e   : >> { %v824_v5 = vsub.f32 %v818_v42, %v2283_v27  ;;  %v825_v6 = vsub.f32 %v819_v43, %v2286_v28  ;;  %v804_v52 = vadd.f32 %v798_v45, %v797_v44  ;;  %v828_v53 = vmul.f32 %v822_v46, %v822_v46 }
 0x14f   : >> { %769 = vadd.xlane.f32.xlu0 %v768_v30  ;;  %v829_v54 = vmul.f32 %v823_v47, %v823_v47  ;;  %v826_v55 = vsub.f32 %v820_v50, %v2302_v35  ;;  %v827_v20 = vsub.f32 %v821_v51, %v2307_v40  ;;  %v807_v21 = vadd.f32 %v800_v49, %v799_v48 }
 0x150   : >> { %v830_v56 = vmul.f32 %v824_v5, %v824_v5  ;;  %v831_v57 = vmul.f32 %v825_v6, %v825_v6 }
 0x151   : >> { %772 = vadd.xlane.f32.xlu1 %v771_v38  ;;  %v834_v27 = vadd.f32 %v829_v54, %v828_v53  ;;  %v832_v58 = vmul.f32 %v826_v55, %v826_v55  ;;  %v833_v28 = vmul.f32 %v827_v20, %v827_v20 }
 0x152   : >> { %v837_v59 = vadd.f32 %v831_v57, %v830_v56 }
 0x153   : >> { %775 = vadd.xlane.f32.xlu0 %v774_v10  ;;  %v840_v60 = vadd.f32 %v833_v28, %v832_v58 }
 0x155   : >> { %802 = vadd.xlane.f32.xlu1 %v801_v14 }
 0x157   : >> { %805 = vadd.xlane.f32.xlu0 %v804_v52 }
 0x159   : >> { %808 = vadd.xlane.f32.xlu1 %v807_v21 }
 0x15b   : >> { %835 = vadd.xlane.f32.xlu0 %v834_v27 }
 0x15d   : >> { %838 = vadd.xlane.f32.xlu1 %v837_v59 }
 0x15f   : >> { %841 = vadd.xlane.f32.xlu0 %v840_v60 }
 0x1d0   : >> { %v694_v35 = vpop.xlane.xlu0 %693 }
 0x1d1   : >> { %704 = vst.msk [vmem:[%s2345_s11] sm:$0xff] %vm703_vm0, %v694_v35 }
 0x1d2   : >> { %v700_v40 = vpop.xlane.xlu1 %699 }
 0x1d3   : >> { %706 = vst.msk [vmem:[%s2345_s11 + $0x10] sm:$0xff] %vm703_vm0, %v700_v40 }
 0x1d4   : >> { %v697_v61 = vpop.xlane.xlu0 %696 }
 0x1d5   : >> { %705 = vst.msk [vmem:[%s2345_s11 + $0x8] sm:$0xff] %vm703_vm0, %v697_v61 }
 0x1d6   : >> { %v729_v62 = vpop.xlane.xlu1 %728 }
 0x1d7   : >> { %737 = vst.msk [vmem:[%s2345_s11] sm:$0xff] %vm736_vm1, %v729_v62 }
 0x1d8   : >> { %v732_v63 = vpop.xlane.xlu0 %731 }
 0x1d9   : >> { %738 = vst.msk [vmem:[%s2345_s11 + $0x8] sm:$0xff] %vm736_vm1, %v732_v63 }
 0x1da   : >> { %v735_v2 = vpop.xlane.xlu1 %734 }
 0x1db   : >> { %739 = vst.msk [vmem:[%s2345_s11 + $0x10] sm:$0xff] %vm736_vm1, %v735_v2 }
 0x1dc   : >> { %v770_v3 = vpop.xlane.xlu0 %769 }
 0x1dd   : >> { %778 = vst.msk [vmem:[%s2345_s11] sm:$0xff] %vm777_vm2, %v770_v3 }
 0x1de   : >> { %v773_v4 = vpop.xlane.xlu1 %772 }
 0x1df   : >> { %779 = vst.msk [vmem:[%s2345_s11 + $0x8] sm:$0xff] %vm777_vm2, %v773_v4 }
 0x1e0   : >> { %v776_v7 = vpop.xlane.xlu0 %775 }
 0x1e1   : >> { %780 = vst.msk [vmem:[%s2345_s11 + $0x10] sm:$0xff] %vm777_vm2, %v776_v7 }
 0x1e2   : >> { %v803_v8 = vpop.xlane.xlu1 %802 }
 0x1e3   : >> { %811 = vst.msk [vmem:[%s2345_s11] sm:$0xff] %vm810_vm3, %v803_v8 }
 0x1e4   : >> { %v806_v9 = vpop.xlane.xlu0 %805 }
 0x1e5   : >> { %812 = vst.msk [vmem:[%s2345_s11 + $0x8] sm:$0xff] %vm810_vm3, %v806_v9 }
 0x1e6   : >> { %v809_v11 = vpop.xlane.xlu1 %808 }
 0x1e7   : >> { %813 = vst.msk [vmem:[%s2345_s11 + $0x10] sm:$0xff] %vm810_vm3, %v809_v11  ;;  %653 = sbr.rel (!%p651_p11) target bundleno = 312 (0x138), region = 232 }
 0x1e8   : >> { %v836_v12 = vpop.xlane.xlu0 %835 }
 0x1e9   : >> { %844 = vst.msk [vmem:[%s2345_s11] sm:$0xff] %vm843_vm4, %v836_v12 }
 0x1ea   : >> { %v839_v13 = vpop.xlane.xlu1 %838 }
 0x1eb   : >> { %845 = vst.msk [vmem:[%s2345_s11 + $0x8] sm:$0xff] %vm843_vm4, %v839_v13 }
 0x1ec   : >> { %v842_v15 = vpop.xlane.xlu0 %841 }
 0x1ed   : >> { %846 = vst.msk [vmem:[%s2345_s11 + $0x10] sm:$0xff] %vm843_vm4, %v842_v15 }
 0x1ee LB: >> { %s1255_s27 = smul.u32 48, %s1728_s28  ;;  %s856_s9 = scalar_lea.sflag [#allocation3], %s1728_s28  ;;  %s1728_s28 = sphi %s2365_s28, %s852_s28  }
 0x1f0   : >> { %s855_s2 = scalar_lea.vmem [#allocation2], %s1255_s27 }
 0x1f1   : >> { %1700 = dma.done.wait %s856_s9, 768 }
 0x1f2   : >> { %1701 = vsyncadd %s856_s9, 4294966528  ;;  %s2445_s22 = scalar_lea.vmem [#allocation10], %s2169_s19  ;;  %v869_v18 = vld [vmem:[%s855_s2] sm:$0xff]  ;;  %v870_v19 = vld [vmem:[%s855_s2 + $0x8] sm:$0xff]  ;;  %s896_s25 = smul.u32 24, %s1728_s28  ;;  %vm898_vm5 = vcmask 48168  }
 0x1f3   : >> { %s862_s1 = scalar_lea.vmem %s2445_s22, %s1255_s27 [#allocation10]  ;;  %v873_v26 = vld [vmem:[%s855_s2 + $0x20] sm:$0xff]  ;;  %v874_v29 = vld [vmem:[%s855_s2 + $0x28] sm:$0xff]  ;;  %v871_v36 = vld [vmem:[%s855_s2 + $0x10] sm:$0xff]  ;;  %s852_s28 = sadd.s32 1, %s1728_s28  }
 0x1f4   : >> { %v863_v16 = vld [vmem:[%s862_s1] sm:$0xff]  ;;  %v864_v17 = vld [vmem:[%s862_s1 + $0x8] sm:$0xff]  ;;  %v865_v30 = vld [vmem:[%s862_s1 + $0x10] sm:$0xff]  ;;  %s897_s20 = scalar_lea.vmem %s2208_s4, %s896_s25  ;;  %p849_p7 = scmp.ge.s32.totalorder %s852_s28, 4  }
 0x1f5   : >> { %v875_v22 = vsub.f32 %v863_v16, %v869_v18  ;;  %v867_v23 = vld [vmem:[%s862_s1 + $0x20] sm:$0xff]  ;;  %v868_v24 = vld [vmem:[%s862_s1 + $0x28] sm:$0xff]  ;;  %v876_v25 = vsub.f32 %v864_v17, %v870_v19  ;;  %v866_v34 = vld [vmem:[%s862_s1 + $0x18] sm:$0xff]  ;;  %v877_v0 = vsub.f32 %v865_v30, %v871_v36 }
 0x1f6   : >> { %v879_v32 = vsub.f32 %v867_v23, %v873_v26  ;;  %v880_v33 = vsub.f32 %v868_v24, %v874_v29  ;;  %v872_v37 = vld [vmem:[%s855_s2 + $0x18] sm:$0xff] }
 0x1f7   : >> { %v881_v31 = vmul.f32 %v875_v22, %v875_v22  ;;  %v882_v38 = vmul.f32 %v876_v25, %v876_v25  ;;  %v878_v1 = vsub.f32 %v866_v34, %v872_v37  ;;  %v883_v43 = vmul.f32 %v877_v0, %v877_v0 }
 0x1f8   : >> { %v885_v39 = vmul.f32 %v879_v32, %v879_v32  ;;  %v886_v41 = vmul.f32 %v880_v33, %v880_v33 }
 0x1f9   : >> { %v887_v42 = vadd.f32 %v882_v38, %v881_v31  ;;  %v884_v44 = vmul.f32 %v878_v1, %v878_v1 }
 0x1fa   : >> { %v893_v45 = vadd.f32 %v886_v41, %v885_v39 }
 0x1fb   : >> { %888 = vadd.xlane.f32.xlu0 %v887_v42  ;;  %v890_v10 = vadd.f32 %v884_v44, %v883_v43 }
 0x1fc   : >> { %894 = vadd.xlane.f32.xlu1 %v893_v45 }
 0x1ff   : >> { %891 = vadd.xlane.f32.xlu0 %v890_v10 }
 0x287   : > { %851 = sbr.rel (!%p849_p7) target bundleno = 494 (0x1ee), region = 243 }
 0x288   : >> { %v889_v14 = vpop.xlane.xlu0 %888 }
 0x289   : >> { %899 = vst.msk [vmem:[%s897_s20] sm:$0xff] %vm898_vm5, %v889_v14  ;;  %v895_v46 = vpop.xlane.xlu1 %894 }
 0x28a   : >> { %901 = vst.msk [vmem:[%s897_s20 + $0x10] sm:$0xff] %vm898_vm5, %v895_v46 }
 0x28c   : >> { %v892_v47 = vpop.xlane.xlu0 %891 }
 0x28d   : >> { %900 = vst.msk [vmem:[%s897_s20 + $0x8] sm:$0xff] %vm898_vm5, %v892_v47 }
 0x28e PF: > { %s2446_s0 = sld [smem:[#allocation31_spill]]  ;;  %s2447_s16 = sld [smem:[#allocation30_spill]] }
 0x28f   : > { %s2448_s25 = sld [smem:[#allocation32_spill]]  ;;  %s2449_s23 = smov %s1708_s24 }
 0x294   : > { %p36_p4 = scmp.ge.s32.totalorder %s2446_s0, 4   ;;  %s2450_s24 = smov %s2447_s16 }
 0x296   :  { %38 = sbr.rel (!%p36_p4) target bundleno = 24 (0x18), region = 254 }
 0x29d   :  { %926 = vsyncpa [#allocation7], 1 }
 0x29e   :  { %928 = vsyncpa [#allocation7 + $0x1], 1 }
 0x29f   :  { %929 = vsyncpa [#allocation9], 1 }
 0x2a0   :  { %931 = vsyncpa [#allocation9 + $0x1], 1 }
 0x2a1   :  { %932 = vsyncpa [#allocation12], 1 }
 0x2a2   :  { %934 = vsyncpa [#allocation12 + $0x1], 1 }
 0x2a3   :  { %935 = vsyncpa [#allocation15], 1 }
 0x2a4   :  { %937 = vsyncpa [#allocation15 + $0x1], 1 }
 0x2a5   :  { %938 = vsyncpa [#allocation18], 1 }
 0x2a6   :  { %940 = vsyncpa [#allocation18 + $0x1], 1 }
 0x2a7   :  { %941 = vsyncmov [#allocation3] }
 0x2aa   :  { %s942_s19 = vpop.sfrf %941 }
 0x2ab   :  { %p1241_p0 = scmp.ne.s32.totalorder %s942_s19, 0 }
 0x2ad   :  { %946 = shalt.err (%p1241_p0)  }
 0x2ae   :  { %948 = vsyncmov [#allocation3 + $0x1] }
 0x2b1   :  { %s949_s17 = vpop.sfrf %948 }
 0x2b2   :  { %p1242_p2 = scmp.ne.s32.totalorder %s949_s17, 0 }
 0x2b4   :  { %953 = shalt.err (%p1242_p2)  }
 0x2b5   :  { %955 = vsyncmov [#allocation3 + $0x2] }
 0x2b8   :  { %s956_s4 = vpop.sfrf %955 }
 0x2b9   :  { %p1243_p5 = scmp.ne.s32.totalorder %s956_s4, 0 }
 0x2bb   :  { %960 = shalt.err (%p1243_p5)  }
 0x2bc   :  { %962 = vsyncmov [#allocation3 + $0x3] }
 0x2bf   :  { %s963_s3 = vpop.sfrf %962 }
 0x2c0   :  { %p1244_p3 = scmp.ne.s32.totalorder %s963_s3, 0 }
 0x2c2   :  { %967 = shalt.err (%p1244_p3)  }

</bundles_post_ra>
